<compile_context>
chip_gen: v5e
topology: v5e:2x2
jax: 0.10.0
libtpu: 0.0.40
codegen_flags: <defaults>
</compile_context>

<pallas_src>
import math

import jax
import jax.numpy as jnp
from jax.experimental import pallas as pl
from jax.experimental.pallas import tpu as pltpu


_SQRT_2_OVER_PI = math.sqrt(2.0 / math.pi)
_VMEM_BUDGET = 48 * 1024 * 1024  # headroom under v7x's 64 MiB physical VMEM


def _gelu_tanh(x):
    # GELU(approximate='tanh'):
    #   0.5 * x * (1 + tanh(sqrt(2/pi) * (x + 0.044715 * x^3)))
    return 0.5 * x * (1.0 + jnp.tanh(_SQRT_2_OVER_PI * (x + 0.044715 * (x * x * x))))


def _mlp_kernel(x_ref, w1_ref, b1_ref, w2_ref, b2_ref, o_ref):
    # x_ref: (TM, C_in); w1_ref: (C_in, H) pre-transposed; w2_ref: (H, C_out).
    x = x_ref[...]
    h = jnp.dot(x, w1_ref[...], preferred_element_type=jnp.float32) + b1_ref[0]
    h = _gelu_tanh(h)
    out = jnp.dot(h, w2_ref[...], preferred_element_type=jnp.float32) + b2_ref[0]
    o_ref[...] = out.astype(o_ref.dtype)


def _round_up(v, mult):
    return ((v + mult - 1) // mult) * mult


def mlp_pallas(x, w1, b1, w2, b2, *, block_rows=256):
    """x: (..., in_features).  w1: (H, C_in), b1: (H,), w2: (C_out, H), b2: (C_out,)."""
    orig_shape = x.shape
    in_features = orig_shape[-1]
    hidden, w1_in = w1.shape
    out_features, w2_in = w2.shape
    assert w1_in == in_features and w2_in == hidden

    # Flatten all leading dims into one row axis M and tile it.
    x2 = x.reshape(-1, in_features)
    m = x2.shape[0]

    # Resident weight/bias footprint (single-buffered, constant index_map).
    itemsize = jnp.dtype(x.dtype).itemsize
    weight_bytes = (in_features * hidden + hidden * out_features
                    + hidden + out_features) * itemsize
    # TODO(synk): if weights alone exceed the VMEM budget (very large f32
    # MLPs), the hidden dim would need an extra grid axis; not needed here.

    # Row tile: multiple of 8 (sublane), capped at block_rows, shrunk so the
    # double-buffered activation tiles + resident weights fit the VMEM budget.
    tm = min(block_rows, _round_up(m, 8))
    per_row_bytes = 2 * (in_features + out_features) * itemsize  # dbl-buffered x/out
    per_row_bytes += (hidden + out_features) * 4                 # f32 intermediates
    while tm > 8 and weight_bytes + tm * per_row_bytes > _VMEM_BUDGET:
        tm = _round_up(tm // 2, 8)

    m_pad = _round_up(m, tm)
    if m_pad != m:
        x2 = jnp.pad(x2, ((0, m_pad - m), (0, 0)))

    # Pre-transpose weights in the wrapper so the kernel never runs an XLU
    # transpose; biases become (1, F) so they sit cleanly in VMEM.
    w1t = jnp.asarray(w1).T            # (C_in, H)
    w2t = jnp.asarray(w2).T            # (H, C_out)
    b1_2 = b1.reshape(1, hidden)
    b2_2 = b2.reshape(1, out_features)

    grid = (m_pad // tm,)

    grid_spec = pltpu.PrefetchScalarGridSpec(
        num_scalar_prefetch=0,
        grid=grid,
        in_specs=[
            pl.BlockSpec((tm, in_features), lambda i: (i, 0)),        # x row tile
            # Constant index_map -> weights/biases DMA'd once, stay resident.
            pl.BlockSpec((in_features, hidden), lambda i: (0, 0)),    # W1^T
            pl.BlockSpec((1, hidden), lambda i: (0, 0)),              # b1
            pl.BlockSpec((hidden, out_features), lambda i: (0, 0)),   # W2^T
            pl.BlockSpec((1, out_features), lambda i: (0, 0)),        # b2
        ],
        out_specs=pl.BlockSpec((tm, out_features), lambda i: (i, 0)),
    )

    out = pl.pallas_call(
        _mlp_kernel,
        out_shape=jax.ShapeDtypeStruct((m_pad, out_features), x.dtype),
        grid_spec=grid_spec,
        compiler_params=pltpu.CompilerParams(
            dimension_semantics=("parallel",),
            vmem_limit_bytes=_VMEM_BUDGET + (8 << 20),
        ),
    )(x2, w1t, b1_2, w2t, b2_2)

    out = out[:m]
    return out.reshape(*orig_shape[:-1], out_features)


def mlp_reference(x, w1, b1, w2, b2):
    """Pure-JAX reference mirroring the PyTorch forward exactly."""
    h = jnp.einsum("...c,hc->...h", x, w1) + b1
    h = 0.5 * h * (1.0 + jnp.tanh(_SQRT_2_OVER_PI * (h + 0.044715 * h ** 3)))
    return jnp.einsum("...h,oh->...o", h, w2) + b2


if __name__ == "__main__":
    # Small shapes consistent with the module: (B, N, C_in), hidden = 4*C_in.
    B, N, C_in = 2, 8, 32
    hidden = 128
    C_out = 32

    key = jax.random.PRNGKey(0)
    kx, kw1, kb1, kw2, kb2 = jax.random.split(key, 5)

    x = jax.random.normal(kx, (B, N, C_in), dtype=jnp.float32)

    # kaiming_normal_(mode='fan_in', nonlinearity='relu'): std = sqrt(2 / fan_in).
    w1 = math.sqrt(2.0 / C_in) * jax.random.normal(kw1, (hidden, C_in), jnp.float32)
    w2 = math.sqrt(2.0 / hidden) * jax.random.normal(kw2, (C_out, hidden), jnp.float32)
    # nn.Linear default bias init: U(-1/sqrt(fan_in), 1/sqrt(fan_in)).
    b1 = jax.random.uniform(kb1, (hidden,), minval=-1.0 / math.sqrt(C_in),
                            maxval=1.0 / math.sqrt(C_in), dtype=jnp.float32)
    b2 = jax.random.uniform(kb2, (C_out,), minval=-1.0 / math.sqrt(hidden),
                            maxval=1.0 / math.sqrt(hidden), dtype=jnp.float32)

    out = mlp_pallas(x, w1, b1, w2, b2)
    out = jax.block_until_ready(out)

    ref = mlp_reference(x, w1, b1, w2, b2)
    assert out.shape == (B, N, C_out)
    assert jnp.allclose(out, ref, atol=1e-4, rtol=1e-4), "mismatch vs reference"

    print("KERNEL_OK")
</pallas_src>

<mosaic_0001>
module attributes {stable_mosaic.version = 11 : i64} {
  func.func @_mlp_kernel(%arg0: i32, %arg1: memref<16x32xf32, #tpu.memory_space<vmem>>, %arg2: memref<32x128xf32, #tpu.memory_space<vmem>>, %arg3: memref<1x128xf32, #tpu.memory_space<vmem>>, %arg4: memref<128x32xf32, #tpu.memory_space<vmem>>, %arg5: memref<1x32xf32, #tpu.memory_space<vmem>>, %arg6: memref<16x32xf32, #tpu.memory_space<vmem>>) attributes {dimension_semantics = [#tpu.dimension_semantics<parallel>], iteration_bounds = array<i64: 1>, scalar_prefetch = 0 : i64, scratch_operands = 0 : i64, tpu.core_type = #tpu.core_type<tc>, window_params = [{transform_indices = @transform_0, window_bounds = array<i64: 16, 32>}, {pipeline_mode = #tpu.pipeline_mode<synchronous>, transform_indices = @transform_1, window_bounds = array<i64: 32, 128>}, {pipeline_mode = #tpu.pipeline_mode<synchronous>, transform_indices = @transform_2, window_bounds = array<i64: 1, 128>}, {pipeline_mode = #tpu.pipeline_mode<synchronous>, transform_indices = @transform_3, window_bounds = array<i64: 128, 32>}, {pipeline_mode = #tpu.pipeline_mode<synchronous>, transform_indices = @transform_4, window_bounds = array<i64: 1, 32>}, {transform_indices = @transform_5, window_bounds = array<i64: 16, 32>}]} {
    %c0 = arith.constant 0 : index
    %c0_0 = arith.constant 0 : index
    %0 = vector.load %arg1[%c0, %c0_0] : memref<16x32xf32, #tpu.memory_space<vmem>>, vector<16x32xf32>
    %c0_1 = arith.constant 0 : index
    %c0_2 = arith.constant 0 : index
    %1 = vector.load %arg2[%c0_1, %c0_2] : memref<32x128xf32, #tpu.memory_space<vmem>>, vector<32x128xf32>
    %cst = arith.constant dense<0.000000e+00> : vector<16x128xf32>
    %2 = tpu.matmul %0, %1, %cst {dimension_numbers = #tpu.dot_dimension_numbers<[1], [0], [0], [1], [0, 0, 1, 1], [], []>} : vector<16x32xf32>, vector<32x128xf32>, vector<16x128xf32> -> vector<16x128xf32>
    %c0_3 = arith.constant 0 : index
    %c0_4 = arith.constant 0 : index
    %3 = vector.load %arg3[%c0_3, %c0_4] : memref<1x128xf32, #tpu.memory_space<vmem>>, vector<1x128xf32>
    %4 = vector.shape_cast %3 : vector<1x128xf32> to vector<128xf32>
    %5 = vector.shape_cast %4 : vector<128xf32> to vector<1x128xf32>
    %6 = vector.broadcast %5 : vector<1x128xf32> to vector<16x128xf32>
    %7 = arith.addf %2, %6 : vector<16x128xf32>
    %cst_5 = arith.constant 5.000000e-01 : f32
    %8 = vector.broadcast %cst_5 : f32 to vector<16x128xf32>
    %9 = arith.mulf %8, %7 : vector<16x128xf32>
    %10 = arith.mulf %7, %7 : vector<16x128xf32>
    %11 = arith.mulf %10, %7 : vector<16x128xf32>
    %cst_6 = arith.constant 4.471500e-02 : f32
    %12 = vector.broadcast %cst_6 : f32 to vector<16x128xf32>
    %13 = arith.mulf %12, %11 : vector<16x128xf32>
    %14 = arith.addf %7, %13 : vector<16x128xf32>
    %cst_7 = arith.constant 0.797884583 : f32
    %15 = vector.broadcast %cst_7 : f32 to vector<16x128xf32>
    %16 = arith.mulf %15, %14 : vector<16x128xf32>
    %17 = math.tanh %16 : vector<16x128xf32>
    %cst_8 = arith.constant 1.000000e+00 : f32
    %18 = vector.broadcast %cst_8 : f32 to vector<16x128xf32>
    %19 = arith.addf %18, %17 : vector<16x128xf32>
    %20 = arith.mulf %9, %19 : vector<16x128xf32>
    %c0_9 = arith.constant 0 : index
    %c0_10 = arith.constant 0 : index
    %21 = vector.load %arg4[%c0_9, %c0_10] : memref<128x32xf32, #tpu.memory_space<vmem>>, vector<128x32xf32>
    %cst_11 = arith.constant dense<0.000000e+00> : vector<16x32xf32>
    %22 = tpu.matmul %20, %21, %cst_11 {dimension_numbers = #tpu.dot_dimension_numbers<[1], [0], [0], [1], [0, 0, 1, 1], [], []>} : vector<16x128xf32>, vector<128x32xf32>, vector<16x32xf32> -> vector<16x32xf32>
    %c0_12 = arith.constant 0 : index
    %c0_13 = arith.constant 0 : index
    %23 = vector.load %arg5[%c0_12, %c0_13] : memref<1x32xf32, #tpu.memory_space<vmem>>, vector<1x32xf32>
    %24 = vector.shape_cast %23 : vector<1x32xf32> to vector<32xf32>
    %25 = vector.shape_cast %24 : vector<32xf32> to vector<1x32xf32>
    %26 = vector.broadcast %25 : vector<1x32xf32> to vector<16x32xf32>
    %27 = arith.addf %22, %26 : vector<16x32xf32>
    %c0_14 = arith.constant 0 : index
    %c0_15 = arith.constant 0 : index
    %28 = vector.load %arg6[%c0_14, %c0_15] : memref<16x32xf32, #tpu.memory_space<vmem>>, vector<16x32xf32>
    tpu.vector_store %arg6[%c0_14, %c0_15], %27 {strides = array<i32>} : memref<16x32xf32, #tpu.memory_space<vmem>>, vector<16x32xf32>,
    return
  }
  func.func @transform_0(%arg0: i32) -> (i32, i32) {
    %c0_i32 = arith.constant 0 : i32
    %c0_i32_0 = arith.constant 0 : i32
    return %arg0, %c0_i32 : i32, i32
  }
  func.func @transform_1(%arg0: i32) -> (i32, i32) {
    %c0_i32 = arith.constant 0 : i32
    %c0_i32_0 = arith.constant 0 : i32
    %c0_i32_1 = arith.constant 0 : i32
    return %c0_i32, %c0_i32_0 : i32, i32
  }
  func.func @transform_2(%arg0: i32) -> (i32, i32) {
    %c0_i32 = arith.constant 0 : i32
    %c0_i32_0 = arith.constant 0 : i32
    %c0_i32_1 = arith.constant 0 : i32
    return %c0_i32, %c0_i32_0 : i32, i32
  }
  func.func @transform_3(%arg0: i32) -> (i32, i32) {
    %c0_i32 = arith.constant 0 : i32
    %c0_i32_0 = arith.constant 0 : i32
    %c0_i32_1 = arith.constant 0 : i32
    return %c0_i32, %c0_i32_0 : i32, i32
  }
  func.func @transform_4(%arg0: i32) -> (i32, i32) {
    %c0_i32 = arith.constant 0 : i32
    %c0_i32_0 = arith.constant 0 : i32
    %c0_i32_1 = arith.constant 0 : i32
    return %c0_i32, %c0_i32_0 : i32, i32
  }
  func.func @transform_5(%arg0: i32) -> (i32, i32) {
    %c0_i32 = arith.constant 0 : i32
    %c0_i32_0 = arith.constant 0 : i32
    return %arg0, %c0_i32 : i32, i32
  }
}

</mosaic_0001>

<bundles_post_ra>
// kernel: tpu_custom_call.1
= control target key start
LH: loop header
LB: loop body
LE: loop exit
PB: predicated region body
PF: predicated region fallthrough
CT: control target
= control target key end

     0   :  { %s307_s0 = inlined_call_operand.vmem [shape: f32[16,32], index: 0, kind: input, shape index: {}]   ;;  %s308_s1 = inlined_call_operand.vmem [shape: f32[32,128], index: 1, kind: input, shape index: {}]   ;;  %s309_s2 = inlined_call_operand.vmem [shape: f32[1,128], index: 2, kind: input, shape index: {}]   ;;  %s310_s3 = inlined_call_operand.vmem [shape: f32[128,32], index: 3, kind: input, shape index: {}]   ;;  %s311_s4 = inlined_call_operand.vmem [shape: f32[1,32], index: 4, kind: input, shape index: {}]   ;;  %s312_s5 = inlined_call_operand.hbm [shape: f32[16,32], index: 5, kind: output, shape index: {}]  }
   0x1   :  { %v26_v0 = vld [vmem:[%s308_s1 + $0x18] sm:$0xff]  ;;  %v25_v1 = vld [vmem:[%s308_s1 + $0x10] sm:$0xff]  ;;  %v24_v2 = vld [vmem:[%s308_s1 + $0x8] sm:$0xff] }
   0x2   :  { %50 = vmatpush.msra.mxu0 %v26_v0  ;;  %v94_v3 = vld [vmem:[%s310_s3 + $0x78] sm:$0xff]  ;;  %v93_v4 = vld [vmem:[%s310_s3 + $0x70] sm:$0xff]  ;;  %v23_v5 = vld [vmem:[%s308_s1] sm:$0xff] }
   0x3   :  { %99 = vmatpush.msra.mxu1 %v94_v3  ;;  %v92_v6 = vld [vmem:[%s310_s3 + $0x68] sm:$0xff]  ;;  %144 = vmatpush.msra.mxu2 %v94_v3 }
   0x4   :  { %51 = vmatpush.msra.mxu0 %v25_v1 }
   0x5   :  { %10 = vsyncpa [#allocation3], 0  ;;  %v21_v7 = vld [vmem:[%s307_s0] sm:$0xff]  ;;  %vm31_vm0 = vcmask 261120   ;;  %100 = vmatpush.msra.mxu1 %v93_v4  ;;  %145 = vmatpush.msra.mxu2 %v93_v4  ;;  %v22_v9 = vld [vmem:[%s307_s0 + $0x8] sm:$0xff]  ;;  %s195_s11 = smov [#allocation2]  }
   0x6   :  { %52 = vmatpush.msra.mxu0 %v24_v2  ;;  %v91_v8 = vld [vmem:[%s310_s3 + $0x60] sm:$0xff]  ;;  %v90_v10 = vld [vmem:[%s310_s3 + $0x58] sm:$0xff]  ;;  %v89_v11 = vld [vmem:[%s310_s3 + $0x50] sm:$0xff]  ;;  %s128_s12 = sshll.u32 %s195_s11, 4  ;;  %s130_s15 = sshll.u32 %s312_s5, 4  ;;  %s129_s12 = int_to_ptr.vmem [resolvable:$true] %s128_s12  ;;  %s131_s15 = int_to_ptr.hbm [resolvable:$true] %s130_s15 }
   0x7   :  { %101 = vmatpush.msra.mxu1 %v92_v6  ;;  %146 = vmatpush.msra.mxu2 %v92_v6  ;;  %v88_v12 = vld [vmem:[%s310_s3 + $0x48] sm:$0xff]  ;;  %v87_v13 = vld [vmem:[%s310_s3 + $0x40] sm:$0xff]  ;;  %v86_v14 = vld [vmem:[%s310_s3 + $0x38] sm:$0xff]  ;;  %s196_s16 = smov 128   ;;  %s197_s17 = smov 8  }
   0x8   :  { %53 = vmatpush.msra.mxu0 %v23_v5  ;;  %v85_v15 = vld [vmem:[%s310_s3 + $0x30] sm:$0xff]  ;;  %v84_v16 = vld [vmem:[%s310_s3 + $0x28] sm:$0xff]  ;;  %v83_v17 = vld [vmem:[%s310_s3 + $0x20] sm:$0xff] }
   0x9   :  { %142 = vmatmul.msk.f32.vlgmr.msra.gmra.mxu0 %vm31_vm0, %v21_v7  ;;  %102 = vmatpush.msra.mxu1 %v91_v8  ;;  %v82_v18 = vld [vmem:[%s310_s3 + $0x18] sm:$0xff]  ;;  %v81_v19 = vld [vmem:[%s310_s3 + $0x10] sm:$0xff]  ;;  %v80_v20 = vld [vmem:[%s310_s3 + $0x8] sm:$0xff] }
   0xa   :  { %147 = vmatpush.msra.mxu2 %v91_v8  ;;  %v79_v21 = vld [vmem:[%s310_s3] sm:$0xff] }
   0xb   :  { %103 = vmatpush.msra.mxu1 %v90_v10  ;;  %v163_v22 = vld [vmem:[%s309_s2] ss:$0 sm:$0xff] }
   0xc   :  { %148 = vmatpush.msra.mxu2 %v90_v10  ;;  %v164_v45 = vld [vmem:[%s311_s4] ss:$0 sm:$0xff] }
   0xd   :  { %104 = vmatpush.msra.mxu1 %v89_v11 }
   0xe   :  { %149 = vmatpush.msra.mxu2 %v89_v11 }
   0xf   :  { %105 = vmatpush.msra.mxu1 %v88_v12 }
  0x10   :  { %150 = vmatpush.msra.mxu2 %v88_v12 }
  0x11   :  { %143 = vmatmul.msk.f32.gmra.mxu0 %vm31_vm0, %v22_v9  ;;  %106 = vmatpush.msra.mxu1 %v87_v13 }
  0x12   :  { %151 = vmatpush.msra.mxu2 %v87_v13 }
  0x13   :  { %107 = vmatpush.msra.mxu1 %v86_v14 }
  0x14   :  { %152 = vmatpush.msra.mxu2 %v86_v14 }
  0x15   :  { %108 = vmatpush.msra.mxu1 %v85_v15 }
  0x16   :  { %153 = vmatpush.msra.mxu2 %v85_v15 }
  0x17   :  { %109 = vmatpush.msra.mxu1 %v84_v16 }
  0x18   :  { %154 = vmatpush.msra.mxu2 %v84_v16 }
  0x19   :  { %110 = vmatpush.msra.mxu1 %v83_v17 }
  0x1a   :  { %155 = vmatpush.msra.mxu2 %v83_v17 }
  0x1b   :  { %111 = vmatpush.msra.mxu1 %v82_v18 }
  0x1c   :  { %156 = vmatpush.msra.mxu2 %v82_v18 }
  0x1d   :  { %112 = vmatpush.msra.mxu1 %v81_v19 }
  0x1e   :  { %157 = vmatpush.msra.mxu2 %v81_v19 }
  0x1f   :  { %113 = vmatpush.msra.mxu1 %v80_v20 }
  0x20   :  { %158 = vmatpush.msra.mxu2 %v80_v20 }
  0x21   :  { %114 = vmatpush.msra.mxu1 %v79_v21 }
  0x22   :  { %159 = vmatpush.msra.mxu2 %v79_v21 }
  0x86   :  { %v55_v23 = vpop.f32.mrf.mxu0 }
  0x87   :  { %v56_v24 = vadd.f32 %v163_v22, %v55_v23 }
  0x89   :  { %v63_v25 = vmul.f32 %v56_v24, %v56_v24  ;;  %v61_v38 = vmul.f32 0.5, %v56_v24 }
  0x8b   :  { %v65_v26 = vmul.f32 %v63_v25, %v56_v24 }
  0x8d   :  { %v67_v27 = vmul.f32 0.044715, %v65_v26 }
  0x8e   :  { %v58_v28 = vpop.f32.mrf.mxu0 }
  0x8f   :  { %v59_v29 = vadd.f32 %v163_v22, %v58_v28  ;;  %v69_v30 = vadd.f32 %v67_v27, %v56_v24 }
  0x91   :  { %v64_v31 = vmul.f32 %v59_v29, %v59_v29  ;;  %v71_v32 = vmul.f32 0.7978846, %v69_v30  ;;  %v62_v42 = vmul.f32 0.5, %v59_v29 }
  0x93   :  { %v66_v33 = vmul.f32 %v64_v31, %v59_v29  ;;  %165 = vtanh.f32 %v71_v32 }
  0x95   :  { %v68_v34 = vmul.f32 0.044715, %v66_v33 }
  0x97   :  { %v70_v35 = vadd.f32 %v68_v34, %v59_v29 }
  0x99   :  { %v166_v36 = vpop.eup %165  ;;  %v72_v37 = vmul.f32 0.7978846, %v70_v35 }
  0x9a   :  { %v75_v39 = vadd.f32 1.0, %v166_v36 }
  0x9b   :  { %167 = vtanh.f32 %v72_v37 }
  0x9c   :  { %v77_v40 = vmul.f32 %v75_v39, %v61_v38 }
  0x9e   :  { %115 = vmatmul.f32.vlgmr.msra.gmra.mxu1 %v77_v40 }
  0xa1   :  { %v168_v41 = vpop.eup %167 }
  0xa2   :  { %v76_v43 = vadd.f32 1.0, %v168_v41 }
  0xa4   :  { %v78_v44 = vmul.f32 %v76_v43, %v62_v42 }
  0xa6   :  { %118 = vmatmul.f32.vlgmr.msra.gmra.mxu2 %v78_v44 }
 0x11b   :  { %v116_v46 = vpop.f32.mrf.mxu1 }
 0x11c   :  { %v117_v47 = vadd.f32 %v164_v45, %v116_v46 }
 0x11e   :  { %122 = vst.msk [vmem:[#allocation2] sm:$0xff] %vm31_vm0, %v117_v47 }
 0x129   :  { %v119_v48 = vpop.f32.mrf.mxu2 }
 0x12a   :  { %v120_v49 = vadd.f32 %v164_v45, %v119_v48 }
 0x12c   :  { %123 = vst.msk [vmem:[#allocation2 + $0x8] sm:$0xff] %vm31_vm0, %v120_v49 }
 0x12d   :  { %136 = dma.vmem_to_hbm [thread:$0]  %s129_s12, 256, %s131_s15, [#allocation3], %s196_s16, %s196_s16, %s197_s17  }
 0x12e   :  { %193 = dma.done.wait [#allocation3], 256  }
 0x12f   :  { %194 = vsyncadd [#allocation3], 4294967040 }
 0x130   :  { %141 = vsyncpa [#allocation3], 1 }

</bundles_post_ra>
